<compile_context>
chip_gen: v6e
topology: v6e:2x2x1
jax: 0.10.0
libtpu: 0.0.40
codegen_flags: <defaults>
</compile_context>

<pallas_src>
import functools

import jax
import jax.numpy as jnp
from jax import lax
from jax.experimental import pallas as pl
from jax.experimental.pallas import tpu as pltpu


def _masked_ce_kernel(logits_ref, tgt_ref, out_ref, loss_acc, *,
                      label_smoothing, chunk):
    """Accumulate sum of per-row CE over the rows of this block whose target >= 0."""
    step = pl.program_id(1)
    n_steps = pl.num_programs(1)

    # Zero this core's running accumulator on its first reduction step.
    @pl.when(step == 0)
    def _():
        loss_acc[...] = jnp.zeros_like(loss_acc)

    tm, C = logits_ref.shape
    eps = float(label_smoothing)

    t = tgt_ref[...]                      # (tm, 1) int32; -1 == masked / padded / garbage row
    valid = t >= 0

    n_full = C // chunk
    rem = C - n_full * chunk

    # (1, chunk) lane-index constant, hoisted once and reused by every chunk.
    col_base = lax.broadcasted_iota(jnp.int32, (1, chunk), 1)

    def accumulate(x_nat, col, carry):
        """Fold one lane-chunk into (running max, sum_exp, picked, sum_x) -- online LSE."""
        m_run, s_run, p_run, sx_run = carry
        x32 = x_nat.astype(jnp.float32)                       # cast once, reuse below
        m_new = jnp.maximum(m_run, jnp.max(x32, axis=-1, keepdims=True))
        s_run = s_run * jnp.exp(m_run - m_new) + jnp.sum(
            jnp.exp(x32 - m_new), axis=-1, keepdims=True)
        # One-hot pick of x[t] via lane-index compare (no cross-lane gather); at most
        # one non-zero per row so the sum is exact.
        p_run = p_run + jnp.sum(jnp.where(col == t, x32, 0.0),
                                axis=-1, keepdims=True)
        if eps != 0.0:                                        # only when label smoothing on
            sx_run = sx_run + jnp.sum(x32, axis=-1, keepdims=True)
        return m_new, s_run, p_run, sx_run

    zero = jnp.zeros((tm, 1), jnp.float32)
    carry = (jnp.full((tm, 1), -jnp.inf, jnp.float32), zero, zero, zero)

    if n_full == 1:
        carry = accumulate(logits_ref[:, pl.ds(0, chunk)], col_base, carry)
    elif n_full > 1:
        def body(ci, c):
            start = pl.multiple_of(ci * chunk, chunk)         # 128-aligned chunk starts
            return accumulate(logits_ref[:, pl.ds(start, chunk)],
                              col_base + ci * chunk, c)
        carry = lax.fori_loop(0, n_full, body, carry, unroll=(n_full <= 8))

    if rem:                                                   # static tail slice (< chunk lanes)
        col_tail = lax.broadcasted_iota(jnp.int32, (1, rem), 1) + n_full * chunk
        carry = accumulate(logits_ref[:, pl.ds(n_full * chunk, rem)], col_tail, carry)

    m_run, s_run, p_run, sx_run = carry
    lse = m_run + jnp.log(s_run)
    if eps != 0.0:
        # PyTorch: (1-eps)*NLL + eps*mean_c(-log p_c) = lse - (1-eps)*x[t] - eps*mean_c(x)
        per_row = lse - (1.0 - eps) * p_run - (eps / C) * sx_run
    else:
        per_row = lse - p_run

    # NaN-safe gating: rows with t < 0 (mask == False, padded rows, or garbage rows of
    # a partial tail block) contribute exactly 0 even if per_row is NaN/inf.
    loss_acc[...] = loss_acc[...] + jnp.where(valid, per_row, 0.0)

    # Flush once per core on its final reduction step.
    @pl.when(step == n_steps - 1)
    def _():
        out_ref[...] = jnp.zeros(out_ref.shape, jnp.float32) + jnp.sum(loss_acc[...])


def _vmem_capacity_bytes():
    """Per-generation VMEM capacity (128 MiB on v5e/v6e, 64 MiB per TC on v7x)."""
    try:
        info = pltpu.get_tpu_info()
        cap = getattr(info, "vmem_capacity_bytes", None)
        if cap:
            return int(cap)
    except Exception:
        pass
    return 64 * 1024 * 1024          # conservative (v7x-sized) fallback


def masked_ce_loss(logits, targets, mask, *, label_smoothing=0.0, tm=None):
    """logits: (N, C) float, targets: (N,) int, mask: (N,) bool -> scalar f32.

    Equals CrossEntropyLoss(label_smoothing, reduction='none')(logits[mask],
    targets[mask]).mean(); NaN when the mask selects no rows (PyTorch empty mean).
    Targets >= C (invalid in PyTorch) silently give loss = logsumexp for that row.
    """
    N, C = logits.shape
    itemsize = jnp.dtype(logits.dtype).itemsize
    mask_b = mask.astype(bool)

    # ---- per-generation VMEM budgets -------------------------------------------
    vmem_cap = _vmem_capacity_bytes()
    per_buf_budget = max(2 * 1024 * 1024, vmem_cap // 6)      # logits are double-buffered
    vmem_limit = min(int(vmem_cap * 0.6), 100 * 1024 * 1024)

    # ---- row-tile selection: biggest tile whose double-buffered native-dtype logits
    # fit the budget (chunk temps are <= ~3*tm*chunk*4 B, well inside the headroom).
    sub = max(8, 32 // itemsize)            # sublane packing: 8 (f32), 16 (bf16/f16)
    if tm is None:
        tm = per_buf_budget // (2 * C * itemsize)
        tm = max(sub, min(1024, (tm // sub) * sub))
    tm = max(sub, (int(tm) // sub) * sub)
    tm = min(tm, ((N + sub - 1) // sub) * sub)

    n_blocks = -(-N // tm)
    # Megacore split only when it divides evenly -> no wasted logits reads and no
    # fully-out-of-range blocks; otherwise a single "core" (free on single-TC parts).
    num_cores = 2 if (n_blocks >= 2 and n_blocks % 2 == 0) else 1
    steps = n_blocks // num_cores
    n_pad = n_blocks * tm

    # Fold the mask into the targets (-1 = ignored) and pad ONLY the targets (4 B/row);
    # the logits are never copied/padded -- the kernel masks the partial tail block.
    tgt_m = jnp.where(mask_b, targets.astype(jnp.int32), jnp.int32(-1))
    if n_pad != N:
        tgt_m = jnp.pad(tgt_m, (0, n_pad - N), constant_values=-1)
    # (n_pad, 1) int32 is lane-padded to 128 in HBM (~512 B/row of DMA); only matters
    # when C*itemsize <~ 2 KiB/row, negligible for vocab-scale C.
    tgt_m = tgt_m.reshape(n_pad, 1)

    # Class-axis chunk for the in-kernel single-pass online LSE (128-aligned when C >= 128).
    chunk = C if C < 128 else (min(C, 512) // 128) * 128

    kernel = functools.partial(_masked_ce_kernel,
                               label_smoothing=float(label_smoothing),
                               chunk=chunk)

    out = pl.pallas_call(
        kernel,
        out_shape=jax.ShapeDtypeStruct((num_cores * 8, 128), jnp.float32),
        grid_spec=pltpu.PrefetchScalarGridSpec(
            num_scalar_prefetch=0,
            grid=(num_cores, steps),
            in_specs=[
                pl.BlockSpec((tm, C), lambda c, i: (c * steps + i, 0)),
                pl.BlockSpec((tm, 1), lambda c, i: (c * steps + i, 0)),
            ],
            out_specs=pl.BlockSpec((8, 128), lambda c, i: (c, 0)),
            scratch_shapes=[pltpu.VMEM((tm, 1), jnp.float32)],
        ),
        compiler_params=pltpu.CompilerParams(
            dimension_semantics=("parallel", "arbitrary"),
            vmem_limit_bytes=vmem_limit),
    )(logits, tgt_m)

    loss_sum = jnp.sum(out.reshape(num_cores, 8, 128)[:, 0, 0])
    cnt = jnp.sum(mask_b.astype(jnp.float32))   # mean over masked rows == sum / count
    return loss_sum / cnt


class Loss:
    """JAX mirror of the PyTorch `Loss` module."""

    def __init__(self, src_name, tgt_name, mask_name, label_smoothing=0.0):
        self.src_name = src_name
        self.tgt_name = tgt_name
        self.mask_name = mask_name
        self.label_smoothing = label_smoothing

    def __call__(self, y_pred, target):
        logits = y_pred[self.src_name]          # (B, S, C), native dtype
        tgt = target[self.tgt_name]             # (B, S)
        mask = target[self.mask_name]           # (B, S) bool
        C = logits.shape[-1]
        return masked_ce_loss(
            logits.reshape(-1, C),
            tgt.reshape(-1),
            mask.reshape(-1),
            label_smoothing=self.label_smoothing,
        )


def _reference(logits, targets, mask, label_smoothing=0.0):
    """Pure-JAX reference for sanity checking."""
    x = logits.astype(jnp.float32)
    lse = jax.nn.logsumexp(x, axis=-1)
    picked = jnp.take_along_axis(x, targets[:, None].astype(jnp.int32), axis=-1)[:, 0]
    mean_x = jnp.mean(x, axis=-1)
    per_row = lse - (1.0 - label_smoothing) * picked - label_smoothing * mean_x
    m = mask.astype(jnp.float32)
    return jnp.sum(per_row * m) / jnp.sum(m)


if __name__ == "__main__":
    key = jax.random.PRNGKey(0)
    k_logits, k_tgt, k_mask = jax.random.split(key, 3)

    # Case 1: small f32 logits, tile == whole array, with and without label smoothing.
    B, S, C = 2, 16, 32
    logits = jax.random.normal(k_logits, (B, S, C), dtype=jnp.float32)
    targets = jax.random.randint(k_tgt, (B, S), 0, C, dtype=jnp.int32)
    mask = jax.random.bernoulli(k_mask, 0.6, (B, S)).at[0, 0].set(True)
    y_pred = {"logits": logits}
    target = {"labels": targets, "valid": mask}
    for ls in (0.0, 0.1):
        loss_mod = Loss("logits", "labels", "valid", label_smoothing=ls)
        out = jax.block_until_ready(loss_mod(y_pred, target))
        ref = _reference(logits.reshape(-1, C), targets.reshape(-1),
                         mask.reshape(-1), label_smoothing=ls)
        assert jnp.allclose(out, ref, atol=1e-5, rtol=1e-5), (ls, out, ref)

    # Case 2: bf16 logits and N not divisible by the tile (exercises the unpadded
    # partial tail block + target-only padding).
    B2, S2 = 2, 13
    logits2 = jax.random.normal(k_logits, (B2, S2, C), dtype=jnp.bfloat16)
    targets2 = jax.random.randint(k_tgt, (B2, S2), 0, C, dtype=jnp.int32)
    mask2 = jax.random.bernoulli(k_mask, 0.5, (B2, S2)).at[0, 0].set(True)
    out2 = jax.block_until_ready(
        Loss("logits", "labels", "valid", label_smoothing=0.1)(
            {"logits": logits2}, {"labels": targets2, "valid": mask2}))
    ref2 = _reference(logits2.reshape(-1, C), targets2.reshape(-1),
                      mask2.reshape(-1), label_smoothing=0.1)
    assert jnp.allclose(out2, ref2, atol=1e-4, rtol=1e-4), (out2, ref2)

    # Case 3: multi-block grid (2 "cores" x 5 steps, partial last row block) and a
    # class axis with a lane remainder (C=160 -> 128-lane chunk + 32-lane tail).
    N3, C3 = 1200, 160
    logits3 = jax.random.normal(k_logits, (N3, C3), dtype=jnp.float32)
    targets3 = jax.random.randint(k_tgt, (N3,), 0, C3, dtype=jnp.int32)
    mask3 = jax.random.bernoulli(k_mask, 0.7, (N3,)).at[0].set(True)
    out3 = jax.block_until_ready(
        masked_ce_loss(logits3, targets3, mask3, label_smoothing=0.05, tm=128))
    ref3 = _reference(logits3, targets3, mask3, label_smoothing=0.05)
    assert jnp.allclose(out3, ref3, atol=1e-4, rtol=1e-4), (out3, ref3)

    print("KERNEL_OK")
</pallas_src>

<mosaic_0001>
module attributes {stable_mosaic.version = 11 : i64} {
  func.func @_masked_ce_kernel(%arg0: i32, %arg1: i32, %arg2: memref<32x32xf32, #tpu.memory_space<vmem>>, %arg3: memref<32x1xi32, #tpu.memory_space<vmem>>, %arg4: memref<8x128xf32, #tpu.memory_space<vmem>>, %arg5: memref<32x1xf32, #tpu.memory_space<vmem>>) attributes {dimension_semantics = [#tpu.dimension_semantics<parallel>, #tpu.dimension_semantics<arbitrary>], iteration_bounds = array<i64: 1, 1>, scalar_prefetch = 0 : i64, scratch_operands = 1 : i64, tpu.core_type = #tpu.core_type<tc>, window_params = [{transform_indices = @transform_0, window_bounds = array<i64: 32, 32>}, {transform_indices = @transform_1, window_bounds = array<i64: 32, 1>}, {transform_indices = @transform_2, window_bounds = array<i64: 8, 128>}]} {
    %c0_i32 = arith.constant 0 : i32
    %0 = arith.cmpi eq, %arg1, %c0_i32 : i32
    %1 = arith.extui %0 : i1 to i32
    %c0_i32_0 = arith.constant 0 : i32
    %2 = arith.cmpi ne, %1, %c0_i32_0 : i32
    scf.if %2 {
      %cst_17 = arith.constant 0.000000e+00 : f32
      %41 = vector.broadcast %cst_17 : f32 to vector<32x1xf32>
      %c0_18 = arith.constant 0 : index
      %c0_19 = arith.constant 0 : index
      %42 = vector.load %arg5[%c0_18, %c0_19] : memref<32x1xf32, #tpu.memory_space<vmem>>, vector<32x1xf32>
      tpu.vector_store %arg5[%c0_18, %c0_19], %41 {strides = array<i32>} : memref<32x1xf32, #tpu.memory_space<vmem>>, vector<32x1xf32>,
    } else {
    }
    %c0 = arith.constant 0 : index
    %c0_1 = arith.constant 0 : index
    %3 = vector.load %arg3[%c0, %c0_1] : memref<32x1xi32, #tpu.memory_space<vmem>>, vector<32x1xi32>
    %c0_i32_2 = arith.constant 0 : i32
    %4 = vector.broadcast %c0_i32_2 : i32 to vector<32x1xi32>
    %5 = arith.cmpi sge, %3, %4 : vector<32x1xi32>
    %6 = tpu.iota {dimensions = array<i32: 1>} : vector<1x32xi32>
    %cst = arith.constant 0.000000e+00 : f32
    %7 = vector.broadcast %cst : f32 to vector<32x1xf32>
    %cst_3 = arith.constant 0xFF800000 : f32
    %8 = vector.broadcast %cst_3 : f32 to vector<32x1xf32>
    %c0_4 = arith.constant 0 : index
    %c0_5 = arith.constant 0 : index
    %9 = vector.load %arg2[%c0_4, %c0_5] : memref<32x32xf32, #tpu.memory_space<vmem>>, vector<32x32xf32>
    %cst_6 = arith.constant dense<0xFF800000> : vector<32xf32>
    %10 = vector.multi_reduction <maximumf>, %9, %cst_6 [1] : vector<32x32xf32> to vector<32xf32>
    %11 = vector.shape_cast %10 : vector<32xf32> to vector<32x1xf32>
    %12 = arith.maximumf %8, %11 : vector<32x1xf32>
    %13 = arith.subf %8, %12 : vector<32x1xf32>
    %14 = math.exp %13 : vector<32x1xf32>
    %15 = arith.mulf %7, %14 : vector<32x1xf32>
    %16 = vector.broadcast %12 : vector<32x1xf32> to vector<32x32xf32>
    %17 = arith.subf %9, %16 : vector<32x32xf32>
    %18 = math.exp %17 : vector<32x32xf32>
    %cst_7 = arith.constant dense<0.000000e+00> : vector<32xf32>
    %19 = vector.multi_reduction <add>, %18, %cst_7 [1] : vector<32x32xf32> to vector<32xf32>
    %20 = vector.shape_cast %19 : vector<32xf32> to vector<32x1xf32>
    %21 = arith.addf %15, %20 : vector<32x1xf32>
    %22 = vector.broadcast %6 : vector<1x32xi32> to vector<32x32xi32>
    %23 = vector.broadcast %3 : vector<32x1xi32> to vector<32x32xi32>
    %24 = arith.cmpi eq, %22, %23 : vector<32x32xi32>
    %cst_8 = arith.constant 0.000000e+00 : f32
    %25 = vector.broadcast %cst_8 : f32 to vector<32x32xf32>
    %26 = arith.select %24, %9, %25 : vector<32x32xi1>, vector<32x32xf32>
    %cst_9 = arith.constant dense<0.000000e+00> : vector<32xf32>
    %27 = vector.multi_reduction <add>, %26, %cst_9 [1] : vector<32x32xf32> to vector<32xf32>
    %28 = vector.shape_cast %27 : vector<32xf32> to vector<32x1xf32>
    %29 = arith.addf %7, %28 : vector<32x1xf32>
    %30 = math.log %21 : vector<32x1xf32>
    %31 = arith.addf %12, %30 : vector<32x1xf32>
    %32 = arith.subf %31, %29 : vector<32x1xf32>
    %c0_10 = arith.constant 0 : index
    %c0_11 = arith.constant 0 : index
    %33 = vector.load %arg5[%c0_10, %c0_11] : memref<32x1xf32, #tpu.memory_space<vmem>>, vector<32x1xf32>
    %cst_12 = arith.constant 0.000000e+00 : f32
    %34 = vector.broadcast %cst_12 : f32 to vector<32x1xf32>
    %35 = arith.select %5, %32, %34 : vector<32x1xi1>, vector<32x1xf32>
    %36 = arith.addf %33, %35 : vector<32x1xf32>
    %c0_13 = arith.constant 0 : index
    %c0_14 = arith.constant 0 : index
    %37 = vector.load %arg5[%c0_13, %c0_14] : memref<32x1xf32, #tpu.memory_space<vmem>>, vector<32x1xf32>
    tpu.vector_store %arg5[%c0_13, %c0_14], %36 {strides = array<i32>} : memref<32x1xf32, #tpu.memory_space<vmem>>, vector<32x1xf32>,
    %c0_i32_15 = arith.constant 0 : i32
    %38 = arith.cmpi eq, %arg1, %c0_i32_15 : i32
    %39 = arith.extui %38 : i1 to i32
    %c0_i32_16 = arith.constant 0 : i32
    %40 = arith.cmpi ne, %39, %c0_i32_16 : i32
    scf.if %40 {
      %cst_17 = arith.constant 0.000000e+00 : f32
      %41 = vector.broadcast %cst_17 : f32 to vector<8x128xf32>
      %c0_18 = arith.constant 0 : index
      %c0_19 = arith.constant 0 : index
      %42 = vector.load %arg5[%c0_18, %c0_19] : memref<32x1xf32, #tpu.memory_space<vmem>>, vector<32x1xf32>
      %43 = vector.shape_cast %42 : vector<32x1xf32> to vector<1x32x1xf32>
      %cst_20 = arith.constant dense<0.000000e+00> : vector<1xf32>
      %44 = vector.multi_reduction <add>, %43, %cst_20 [1, 2] : vector<1x32x1xf32> to vector<1xf32>
      %45 = vector.shape_cast %44 : vector<1xf32> to vector<1x1x1xf32>
      %46 = vector.extract %45[0, 0, 0] : f32 from vector<1x1x1xf32>
      %47 = vector.broadcast %46 : f32 to vector<8x128xf32>
      %48 = arith.addf %41, %47 : vector<8x128xf32>
      %c0_21 = arith.constant 0 : index
      %c0_22 = arith.constant 0 : index
      %49 = vector.load %arg4[%c0_21, %c0_22] : memref<8x128xf32, #tpu.memory_space<vmem>>, vector<8x128xf32>
      tpu.vector_store %arg4[%c0_21, %c0_22], %48 {strides = array<i32>} : memref<8x128xf32, #tpu.memory_space<vmem>>, vector<8x128xf32>,
    } else {
    }
    return
  }
  func.func @transform_0(%arg0: i32, %arg1: i32) -> (i32, i32) {
    %c1_i32 = arith.constant 1 : i32
    %0 = arith.muli %arg0, %c1_i32 : i32
    %1 = arith.addi %0, %arg1 : i32
    %c0_i32 = arith.constant 0 : i32
    %c0_i32_0 = arith.constant 0 : i32
    return %1, %c0_i32 : i32, i32
  }
  func.func @transform_1(%arg0: i32, %arg1: i32) -> (i32, i32) {
    %c1_i32 = arith.constant 1 : i32
    %0 = arith.muli %arg0, %c1_i32 : i32
    %1 = arith.addi %0, %arg1 : i32
    %c0_i32 = arith.constant 0 : i32
    %c0_i32_0 = arith.constant 0 : i32
    return %1, %c0_i32 : i32, i32
  }
  func.func @transform_2(%arg0: i32, %arg1: i32) -> (i32, i32) {
    %c0_i32 = arith.constant 0 : i32
    %c0_i32_0 = arith.constant 0 : i32
    return %arg0, %c0_i32 : i32, i32
  }
}

</mosaic_0001>

<bundles_post_ra>
// kernel: tpu_custom_call.1
= control target key start
LH: loop header
LB: loop body
LE: loop exit
PB: predicated region body
PF: predicated region fallthrough
CT: control target
= control target key end

     0   :  { %vm79_vm0 = vcmask 261120   ;;  %v310_v6 = vmov 0   ;;  %s425_s0 = inlined_call_operand.vmem [shape: f32[32,32], index: 0, kind: input, shape index: {}]   ;;  %s426_s1 = inlined_call_operand.vmem [shape: s32[32,1], index: 1, kind: input, shape index: {}]   ;;  %s427_s2 = inlined_call_operand.hbm [shape: f32[8,128], index: 2, kind: output, shape index: {}]  }
   0x1   :  { %v75_v0 = vld [vmem:[%s425_s0] sm:$0xff]  ;;  %v77_v1 = vld [vmem:[%s425_s0 + $0x10] sm:$0xff]  ;;  %v337_v2 = vld [vmem:[%s425_s0 + $0x8] sm:$0xff]  ;;  %263 = vset.pattern.permute.xlu1 %v310_v6  ;;  %262 = vset.pattern.permute.xlu0 %v310_v6 }
   0x2   :  { %v80_v3 = vsel %vm79_vm0, %v75_v0, -inf  ;;  %v86_v4 = vsel %vm79_vm0, %v77_v1, -inf  ;;  %v344_v5 = vld [vmem:[%s425_s0 + $0x18] sm:$0xff]  ;;  %v83_v7 = vsel %vm79_vm0, %v337_v2, -inf }
   0x3   :  { %81 = vmax.xlane.f32.xlu0 %v80_v3  ;;  %87 = vmax.xlane.f32.xlu1 %v86_v4  ;;  %v89_v8 = vsel %vm79_vm0, %v344_v5, -inf }
   0x4   :  { %7 = vsyncpa [#allocation4], 0  ;;  %v353_v9 = vld [vmem:[%s426_s1 + $0x8] sm:$0xff]  ;;  %v359_v10 = vld [vmem:[%s426_s1 + $0x10] sm:$0xff]  ;;  %v73_v26 = vlaneseq  ;;  %vm60_vm5 = vcmask 7168   ;;  %v311_v47 = vmov 0.0  }
   0x5   :  { %v364_v11 = vld [vmem:[%s426_s1] sm:$0xff]  ;;  %v371_v12 = vld [vmem:[%s426_s1 + $0x18] sm:$0xff]  ;;  %61 = vst.msk [vmem:[#allocation2] sm:$0xff] %vm60_vm5, %v311_v47  ;;  %62 = vst.msk [vmem:[#allocation2 + $0x8] sm:$0xff] %vm60_vm5, %v311_v47  ;;  %vm71_vm7 = vcmp.ge.s32.totalorder %v359_v10, 0  ;;  %vm70_vm8 = vcmp.ge.s32.totalorder %v353_v9, 0 }
   0x6   :  { %v74_v27 = vand.u32 127, %v73_v26  ;;  %63 = vst.msk [vmem:[#allocation2 + $0x10] sm:$0xff] %vm60_vm5, %v311_v47  ;;  %64 = vst.msk [vmem:[#allocation2 + $0x18] sm:$0xff] %vm60_vm5, %v311_v47  ;;  %vm69_vm6 = vcmp.ge.s32.totalorder %v364_v11, 0  ;;  %vm72_vm9 = vcmp.ge.s32.totalorder %v371_v12, 0  ;;  %s312_s1 = smov [#allocation3]  }
   0x7   :  { %84 = vmax.xlane.f32.xlu0 %v83_v7  ;;  %90 = vmax.xlane.f32.xlu1 %v89_v8  ;;  %s237_s24 = sshll.u32 %s312_s1, 4  ;;  %s238_s24 = int_to_ptr.vmem [resolvable:$true] %s237_s24 }
   0x8   :  { %s288_s26 = scalar_lea.vmem %s238_s24, 128  ;;  %p293_p1 = scmp.lt.s32.totalorder %s238_s24, %s238_s24 }
   0x9   :  { %p289_p0 = scmp.ne.s32.totalorder %s238_s24, %s288_s26  ;;  %p294_p2 = scmp.lt.s32.totalorder %s288_s26, %s288_s26 }
   0xb   :  { %p295_p3 = por %p294_p2, %p293_p1 }
   0xd   :  { %p296_p4 = pnand %p295_p3, %p289_p0 }
  0x18   :  { %140 = vperm.xlu1 %263, %v353_v9  }
  0x1c   :  { %143 = vperm.xlu1 %263, %v359_v10  }
  0x1d   :  { %137 = vperm.xlu0 %262, %v364_v11  }
  0x20   :  { %146 = vperm.xlu1 %263, %v371_v12  }
  0x8c   :  { %v374_v13 = vpop.xlane.xlu0 %81  ;;  %v376_v14 = vpop.xlane.xlu1 %87 }
  0x8d   :  { %v108_v15 = vsub.f32 %v75_v0, %v374_v13  ;;  %v110_v16 = vsub.f32 %v77_v1, %v376_v14  ;;  %v92_v48 = vsub.f32 -inf, %v374_v13  ;;  %v94_v49 = vsub.f32 -inf, %v376_v14 }
  0x8f   :  { %v112_v17 = vmul.f32 1.442695, %v108_v15  ;;  %v116_v18 = vmul.f32 1.442695, %v110_v16  ;;  %v96_v50 = vmul.f32 1.442695, %v92_v48 }
  0x90   :  { %v380_v19 = vpop.xlane.xlu0 %84  ;;  %v382_v20 = vpop.xlane.xlu1 %90  ;;  %v100_v52 = vmul.f32 1.442695, %v94_v49 }
  0x91   :  { %v109_v21 = vsub.f32 %v337_v2, %v380_v19  ;;  %264 = vpow2.f32 %v112_v17  ;;  %v111_v22 = vsub.f32 %v344_v5, %v382_v20  ;;  %v93_v51 = vsub.f32 -inf, %v380_v19 }
  0x92   :  { %266 = vpow2.f32 %v116_v18  ;;  %v95_v54 = vsub.f32 -inf, %v382_v20 }
  0x93   :  { %v114_v23 = vmul.f32 1.442695, %v109_v21  ;;  %v118_v24 = vmul.f32 1.442695, %v111_v22  ;;  %v98_v53 = vmul.f32 1.442695, %v93_v51 }
  0x94   :  { %v141_v25 = vpop.permute.xlu1 %140  ;;  %v102_v55 = vmul.f32 1.442695, %v95_v54 }
  0x95   :  { %268 = vpow2.f32 %v114_v23  ;;  %vm149_vm3 = vcmp.eq.s32.totalorder %v74_v27, %v141_v25  ;;  %v188_v23 = vld [vmem:[#allocation2] sm:$0xff] }
  0x96   :  { %270 = vpow2.f32 %v118_v24  ;;  %v153_v43 = vsel %vm149_vm3, %v337_v2, 0.0 }
  0x97   :  { %v159_v44 = vsel %vm79_vm0, %v153_v43, 0.0  ;;  %272 = vpow2.f32 %v96_v50 }
  0x98   :  { %v144_v29 = vpop.permute.xlu1 %143  ;;  %v138_v32 = vpop.permute.xlu0 %137  ;;  %274 = vpow2.f32 %v100_v52 }
  0x99   :  { %vm150_vm1 = vcmp.eq.s32.totalorder %v74_v27, %v144_v29  ;;  %vm148_vm2 = vcmp.eq.s32.totalorder %v74_v27, %v138_v32  ;;  %276 = vpow2.f32 %v98_v53 }
  0x9a   :  { %v154_v35 = vsel %vm150_vm1, %v77_v1, 0.0  ;;  %v152_v40 = vsel %vm148_vm2, %v75_v0, 0.0  ;;  %278 = vpow2.f32 %v102_v55 }
  0x9b   :  { %v162_v39 = vsel %vm79_vm0, %v154_v35, 0.0  ;;  %v156_v42 = vsel %vm79_vm0, %v152_v40, 0.0  ;;  %v189_v35 = vld [vmem:[#allocation2 + $0x8] sm:$0xff]  ;;  %v191_v40 = vld [vmem:[#allocation2 + $0x18] sm:$0xff] }
  0x9c   :  { %v147_v41 = vpop.permute.xlu1 %146 }
  0x9d   :  { %vm151_vm4 = vcmp.eq.s32.totalorder %v74_v27, %v147_v41 }
  0x9e   :  { %v265_v28 = vpop.eup %264  ;;  %v155_v45 = vsel %vm151_vm4, %v344_v5, 0.0 }
  0x9f   :  { %v120_v30 = vsel %vm79_vm0, %v265_v28, 0.0  ;;  %v267_v31 = vpop.eup %266  ;;  %v165_v46 = vsel %vm79_vm0, %v155_v45, 0.0 }
  0xa0   :  { %121 = vadd.xlane.f32.xlu1 %v120_v30  ;;  %v126_v33 = vsel %vm79_vm0, %v267_v31, 0.0 }
  0xa2   :  { %v269_v34 = vpop.eup %268 }
  0xa3   :  { %v123_v36 = vsel %vm79_vm0, %v269_v34, 0.0  ;;  %v271_v37 = vpop.eup %270 }
  0xa4   :  { %127 = vadd.xlane.f32.xlu1 %v126_v33  ;;  %124 = vadd.xlane.f32.xlu0 %v123_v36  ;;  %v129_v38 = vsel %vm79_vm0, %v271_v37, 0.0  ;;  %v273_v56 = vpop.eup %272  ;;  %v190_v33 = vld [vmem:[#allocation2 + $0x10] sm:$0xff] }
  0xa5   :  { %v275_v57 = vpop.eup %274  ;;  %v104_v58 = vmul.f32 0.0, %v273_v56 }
  0xa6   :  { %v277_v59 = vpop.eup %276  ;;  %v106_v62 = vmul.f32 0.0, %v275_v57 }
  0xa7   :  { %v105_v63 = vmul.f32 0.0, %v277_v59  ;;  %v279_v0 = vpop.eup %278 }
  0xa8   :  { %130 = vadd.xlane.f32.xlu1 %v129_v38  ;;  %163 = vadd.xlane.f32.xlu0 %v162_v39  ;;  %v107_v5 = vmul.f32 0.0, %v279_v0 }
  0xac   :  { %157 = vadd.xlane.f32.xlu1 %v156_v42 }
  0xb0   :  { %160 = vadd.xlane.f32.xlu1 %v159_v44 }
  0xb4   :  { %166 = vadd.xlane.f32.xlu1 %v165_v46 }
 0x129   :  { %v122_v60 = vpop.xlane.xlu1 %121 }
 0x12a   :  { %v132_v61 = vadd.f32 %v122_v60, %v104_v58 }
 0x12c   :  { %280 = vlog2.f32 %v132_v61 }
 0x12d   :  { %v128_v1 = vpop.xlane.xlu1 %127  ;;  %v125_v2 = vpop.xlane.xlu0 %124 }
 0x12e   :  { %v134_v3 = vadd.f32 %v128_v1, %v106_v62  ;;  %v133_v4 = vadd.f32 %v125_v2, %v105_v63 }
 0x130   :  { %282 = vlog2.f32 %v134_v3 }
 0x131   :  { %284 = vlog2.f32 %v133_v4  ;;  %v131_v6 = vpop.xlane.xlu1 %130  ;;  %v164_v32 = vpop.xlane.xlu0 %163 }
 0x132   :  { %v135_v7 = vadd.f32 %v131_v6, %v107_v5 }
 0x134   :  { %286 = vlog2.f32 %v135_v7 }
 0x135   :  { %v158_v15 = vpop.xlane.xlu1 %157 }
 0x139   :  { %v281_v8 = vpop.eup %280  ;;  %v161_v25 = vpop.xlane.xlu1 %160 }
 0x13a   :  { %v173_v16 = vmul.f32 0.6931472, %v281_v8 }
 0x13c   :  { %v180_v17 = vadd.f32 %v173_v16, %v374_v13 }
 0x13d   :  { %v283_v18 = vpop.eup %282  ;;  %v167_v10 = vpop.xlane.xlu1 %166 }
 0x13e   :  { %v285_v21 = vpop.eup %284  ;;  %v184_v22 = vsub.f32 %v180_v17, %v158_v15  ;;  %v177_v24 = vmul.f32 0.6931472, %v283_v18 }
 0x13f   :  { %v175_v26 = vmul.f32 0.6931472, %v285_v21 }
 0x140   :  { %v192_v27 = vsel %vm69_vm6, %v184_v22, 0.0  ;;  %v182_v28 = vadd.f32 %v177_v24, %v376_v14 }
 0x141   :  { %v287_v29 = vpop.eup %286  ;;  %v196_v30 = vadd.f32 %v192_v27, %v188_v23  ;;  %v181_v31 = vadd.f32 %v175_v26, %v380_v19 }
 0x142   :  { %v179_v13 = vmul.f32 0.6931472, %v287_v29  ;;  %v186_v11 = vsub.f32 %v182_v28, %v164_v32 }
 0x143   :  { %201 = vst.msk [vmem:[#allocation2] sm:$0xff] %vm60_vm5, %v196_v30  ;;  %v185_v34 = vsub.f32 %v181_v31, %v161_v25 }
 0x144   :  { %v183_v36 = vadd.f32 %v179_v13, %v382_v20  ;;  %v194_v37 = vsel %vm71_vm7, %v186_v11, 0.0 }
 0x145   :  { %v193_v14 = vsel %vm70_vm8, %v185_v34, 0.0  ;;  %v198_v38 = vadd.f32 %v194_v37, %v190_v33 }
 0x146   :  { %v197_v39 = vadd.f32 %v193_v14, %v189_v35  ;;  %v187_v19 = vsub.f32 %v183_v36, %v167_v10 }
 0x147   :  { %203 = vst.msk [vmem:[#allocation2 + $0x10] sm:$0xff] %vm60_vm5, %v198_v38 }
 0x148   :  { %202 = vst.msk [vmem:[#allocation2 + $0x8] sm:$0xff] %vm60_vm5, %v197_v39  ;;  %v195_v9 = vsel %vm72_vm9, %v187_v19, 0.0 }
 0x149   :  { %v199_v41 = vadd.f32 %v195_v9, %v191_v40 }
 0x14a   :  { %v208_v42 = vld [vmem:[#allocation2] sm:$0xff] }
 0x14b   :  { %204 = vst.msk [vmem:[#allocation2 + $0x18] sm:$0xff] %vm60_vm5, %v199_v41  ;;  %v212_v44 = vsel %vm60_vm5, %v208_v42, 0.0 }
 0x14e   :  { %v210_v20 = vld [vmem:[#allocation2 + $0x10] sm:$0xff] }
 0x14f   :  { %v209_v43 = vld [vmem:[#allocation2 + $0x8] sm:$0xff]  ;;  %v215_v47 = vsel %vm60_vm5, %v210_v20, 0.0 }
 0x150   :  { %v213_v12 = vsel %vm60_vm5, %v209_v43, 0.0 }
 0x151   :  { %v214_v45 = vadd.f32 %v213_v12, %v212_v44 }
 0x152   :  { %v211_v46 = vld [vmem:[#allocation2 + $0x18] sm:$0xff] }
 0x153   :  { %v216_v48 = vadd.f32 %v215_v47, %v214_v45  ;;  %v217_v49 = vsel %vm60_vm5, %v211_v46, 0.0 }
 0x155   :  { %v218_v50 = vadd.f32 %v217_v49, %v216_v48 }
 0x157   :  { %219 = vadd.xlane.f32.xlu0 %v218_v50 }
 0x1e0   :  { %v220_v51 = vpop.xlane.xlu0 %219 }
 0x1e1   :  { %v221_v52 = vrot.slane %v220_v51, 4 }
 0x1e3   :  { %v222_v53 = vadd.f32 %v221_v52, %v220_v51 }
 0x1e5   :  { %v223_v54 = vrot.slane %v222_v53, 2 }
 0x1e7   :  { %v224_v55 = vadd.f32 %v223_v54, %v222_v53 }
 0x1e9   :  { %v225_v56 = vrot.slane %v224_v55, 1 }
 0x1eb   :  { %v226_v57 = vadd.f32 %v225_v56, %v224_v55 }
 0x1ed   :  { %257 = vpush %v226_v57 }
 0x21e   :  { %s258_s25 = spop %257 }
 0x21f   :  { %v228_v58 = vstv %s258_s25 }
 0x220   :  { %230 = vst [vmem:[#allocation3] sm:$0xff] %v228_v58 }
 0x221   :  { %299 = shalt.err (!%p296_p4)
}
 0x222   :  { %240 = dma.vmem_to_hbm [thread:$0]  %s238_s24, 128, %s427_s2, [#allocation4]  }
 0x223   :  { %308 = dma.done.wait [#allocation4], 128  }
 0x224   :  { %309 = vsyncadd [#allocation4], 4294967168 }
 0x225   :  { %244 = vsyncpa [#allocation4], 1 }

</bundles_post_ra>
